<compile_context>
chip_gen: v7x
topology: tpu7x:2x2x1
jax: 0.10.0
libtpu: 0.0.40
codegen_flags: <defaults>
</compile_context>

<pallas_src>
import math

import jax
import jax.numpy as jnp
from jax.experimental import pallas as pl
from jax.experimental.pallas import tpu as pltpu


def _drelu_tile_kernel(a_ref, b_ref, o_ref):
    # a_ref / b_ref / o_ref: (TR, LANE) VMEM tiles.
    o_ref[...] = jnp.maximum(a_ref[...], 0) - jnp.maximum(b_ref[...], 0)


def _drelu_pair_kernel(x_ref, o_ref):
    # Fallback for ragged per-half sizes. x_ref: (2, M), o_ref: (1, M).
    o_ref[...] = jnp.maximum(x_ref[0:1, :], 0) - jnp.maximum(x_ref[1:2, :], 0)


def _pick_lane_width(m, max_lanes=2048):
    """Largest multiple of 128 that divides m, capped at max_lanes (or None)."""
    if m < 128 or m % 128 != 0:
        return None
    base = m // 128
    for d in range(min(base, max_lanes // 128), 0, -1):
        if base % d == 0:
            return 128 * d
    return None


def _pick_row_tile(r, lane, itemsize, max_block_bytes=1 << 20):
    """Row (sublane) tile: multiple of 8 (or full extent), ~1 MiB block budget."""
    if r <= 8:
        return r  # full extent (allowed even if not a multiple of 8)
    budget_rows = max(8, (max_block_bytes // (lane * itemsize)) // 8 * 8)
    return min((r // 8) * 8, budget_rows)


def drelu(x, dim=1):
    """Pallas DReLU: split `x` in half along `dim`, return relu(a) - relu(b)."""
    shape = x.shape
    c = shape[dim]
    assert c % 2 == 0, "split dim must be even for DReLU"
    half = c // 2
    outer = math.prod(shape[:dim])
    inner = math.prod(shape[dim + 1:])
    m = half * inner
    out_final_shape = shape[:dim] + (half,) + shape[dim + 1:]
    itemsize = jnp.dtype(x.dtype).itemsize

    lane = _pick_lane_width(m)

    if lane is not None:
        # Main path: lane-dense, sublane-aligned 2D tiles over the flat half.
        r = m // lane
        tr = _pick_row_tile(r, lane, itemsize)
        x4 = x.reshape(outer, 2, r, lane)  # free contiguous reshape
        grid = (outer, pl.cdiv(r, tr))
        blk_in = (pl.Squeezed(), pl.Squeezed(), tr, lane)
        blk_out = (pl.Squeezed(), tr, lane)
        out = pl.pallas_call(
            _drelu_tile_kernel,
            out_shape=jax.ShapeDtypeStruct((outer, r, lane), x.dtype),
            grid_spec=pl.GridSpec(
                grid=grid,
                in_specs=[
                    pl.BlockSpec(blk_in, lambda o, rb: (o, 0, rb, 0)),  # a half
                    pl.BlockSpec(blk_in, lambda o, rb: (o, 1, rb, 0)),  # b half
                ],
                out_specs=pl.BlockSpec(blk_out, lambda o, rb: (o, rb, 0)),
            ),
            compiler_params=pltpu.CompilerParams(
                dimension_semantics=("parallel", "parallel"),
            ),
        )(x4, x4)
    else:
        # Ragged fallback: both halves in one full-extent (2, M) block per step.
        x3 = x.reshape(outer, 2, m)
        out = pl.pallas_call(
            _drelu_pair_kernel,
            out_shape=jax.ShapeDtypeStruct((outer, 1, m), x.dtype),
            grid_spec=pl.GridSpec(
                grid=(outer,),
                in_specs=[pl.BlockSpec((pl.Squeezed(), 2, m), lambda o: (o, 0, 0))],
                out_specs=pl.BlockSpec((pl.Squeezed(), 1, m), lambda o: (o, 0, 0)),
            ),
            compiler_params=pltpu.CompilerParams(
                dimension_semantics=("parallel",),
            ),
        )(x3)

    return out.reshape(out_final_shape)


if __name__ == "__main__":
    key = jax.random.PRNGKey(0)
    x = jax.random.normal(key, (2, 4, 16, 16), dtype=jnp.float32)

    y = drelu(x)  # dim=1, matching the module default
    y = jax.block_until_ready(y)

    # Reference check (plain JAX)
    a, b = jnp.split(x, 2, axis=1)
    ref = jnp.maximum(a, 0) - jnp.maximum(b, 0)
    assert y.shape == (2, 2, 16, 16)
    assert jnp.allclose(y, ref, atol=1e-6, rtol=1e-6)

    print("KERNEL_OK")
</pallas_src>

<mosaic_0001>
module attributes {stable_mosaic.version = 11 : i64} {
  func.func @_drelu_tile_kernel(%arg0: i32, %arg1: i32, %arg2: memref<1x1x1x512xf32, #tpu.memory_space<vmem>>, %arg3: memref<1x1x1x512xf32, #tpu.memory_space<vmem>>, %arg4: memref<1x1x512xf32, #tpu.memory_space<vmem>>) attributes {dimension_semantics = [#tpu.dimension_semantics<parallel>, #tpu.dimension_semantics<parallel>], iteration_bounds = array<i64: 2, 1>, scalar_prefetch = 0 : i64, scratch_operands = 0 : i64, tpu.core_type = #tpu.core_type<tc>, window_params = [{transform_indices = @transform_0, window_bounds = array<i64: 1, 1, 1, 512>}, {transform_indices = @transform_1, window_bounds = array<i64: 1, 1, 1, 512>}, {transform_indices = @transform_2, window_bounds = array<i64: 1, 1, 512>}]} {
    %c0 = arith.constant 0 : index
    %c0_0 = arith.constant 0 : index
    %c0_1 = arith.constant 0 : index
    %c0_2 = arith.constant 0 : index
    %0 = vector.load %arg2[%c0, %c0_0, %c0_1, %c0_2] : memref<1x1x1x512xf32, #tpu.memory_space<vmem>>, vector<1x1x1x512xf32>
    %1 = vector.shape_cast %0 : vector<1x1x1x512xf32> to vector<1x512xf32>
    %cst = arith.constant 0.000000e+00 : f32
    %2 = vector.broadcast %cst : f32 to vector<1x512xf32>
    %3 = arith.maximumf %1, %2 : vector<1x512xf32>
    %c0_3 = arith.constant 0 : index
    %c0_4 = arith.constant 0 : index
    %c0_5 = arith.constant 0 : index
    %c0_6 = arith.constant 0 : index
    %4 = vector.load %arg3[%c0_3, %c0_4, %c0_5, %c0_6] : memref<1x1x1x512xf32, #tpu.memory_space<vmem>>, vector<1x1x1x512xf32>
    %5 = vector.shape_cast %4 : vector<1x1x1x512xf32> to vector<1x512xf32>
    %cst_7 = arith.constant 0.000000e+00 : f32
    %6 = vector.broadcast %cst_7 : f32 to vector<1x512xf32>
    %7 = arith.maximumf %5, %6 : vector<1x512xf32>
    %8 = arith.subf %3, %7 : vector<1x512xf32>
    %c0_8 = arith.constant 0 : index
    %c0_9 = arith.constant 0 : index
    %c0_10 = arith.constant 0 : index
    %9 = vector.load %arg4[%c0_8, %c0_9, %c0_10] : memref<1x1x512xf32, #tpu.memory_space<vmem>>, vector<1x1x512xf32>
    %10 = vector.shape_cast %9 : vector<1x1x512xf32> to vector<1x512xf32>
    %11 = vector.shape_cast %8 : vector<1x512xf32> to vector<1x1x512xf32>
    tpu.vector_store %arg4[%c0_8, %c0_9, %c0_10], %11 {strides = array<i32>} : memref<1x1x512xf32, #tpu.memory_space<vmem>>, vector<1x1x512xf32>,
    return
  }
  func.func @transform_0(%arg0: i32, %arg1: i32) -> (i32, i32, i32, i32) {
    %c0_i32 = arith.constant 0 : i32
    %c0_i32_0 = arith.constant 0 : i32
    %c0_i32_1 = arith.constant 0 : i32
    return %arg0, %c0_i32, %arg1, %c0_i32_0 : i32, i32, i32, i32
  }
  func.func @transform_1(%arg0: i32, %arg1: i32) -> (i32, i32, i32, i32) {
    %c1_i32 = arith.constant 1 : i32
    %c0_i32 = arith.constant 0 : i32
    %c0_i32_0 = arith.constant 0 : i32
    return %arg0, %c1_i32, %arg1, %c0_i32 : i32, i32, i32, i32
  }
  func.func @transform_2(%arg0: i32, %arg1: i32) -> (i32, i32, i32) {
    %c0_i32 = arith.constant 0 : i32
    %c0_i32_0 = arith.constant 0 : i32
    return %arg0, %arg1, %c0_i32 : i32, i32, i32
  }
}

</mosaic_0001>

<bundles_post_ra>
// kernel: tpu_custom_call.1
= control target key start
LH: loop header
LB: loop body
LE: loop exit
PB: predicated region body
PF: predicated region fallthrough
CT: control target
= control target key end

     0   :  { %7 = vsyncpa [#allocation3], 0  ;;  %s834_s0 = inlined_call_operand.hbm [shape: f32[2,2,1,512], index: 0, kind: input, shape index: {}]   ;;  %s835_s1 = inlined_call_operand.hbm [shape: f32[2,2,1,512], index: 1, kind: input, shape index: {}]   ;;  %s836_s2 = inlined_call_operand.hbm [shape: f32[2,1,512], index: 2, kind: output, shape index: {}]  }
   0x1   :  { %9 = vsyncpa [#allocation3 + $0x1], 0 }
   0x2   :  { %10 = vsyncpa [#allocation6], 0 }
   0x3   :  { %12 = vsyncpa [#allocation6 + $0x1], 0 }
   0x4   :  { %13 = vsyncpa [#allocation4], 0 }
   0x5   :  { %15 = vsyncpa [#allocation4 + $0x1], 0  ;;  %s615_s9 = smov 0   ;;  %s617_s10 = smov 0  }
   0x6   :  { %s619_s11 = smov 0   ;;  %s621_s12 = smov 0  }
   0x7   :  { %s623_s13 = smov 0   ;;  %s625_s14 = smov 0  }
   0x8 LB: > { %s359_s15 = sadd.s32 4294967295, %s595_s14   ;;  %s360_s16 = sadd.s32 4294967294, %s595_s14   ;;  %s595_s14 = sphi %s625_s14, %s21_s14   ;;  %s591_s13 = sphi %s623_s13, %s856_s13   ;;  %s587_s12 = sphi %s621_s12, %s855_s12   ;;  %s583_s11 = sphi %s619_s11, %s854_s11   ;;  %s579_s10 = sphi %s617_s10, %s853_s10   ;;  %s575_s9 = sphi %s615_s9, %s852_s9  }
   0x9   : > { %s33_s17 = sadd.s32 1, %s591_s13  ;;  %s42_s18 = sadd.s32 1, %s583_s11 }
   0xa   : > { %p35_p0 = scmp.ge.s32.totalorder %s33_s17, 2  ;;  %p49_p1 = scmp.ne.s32.totalorder %s583_s11, %s579_s10 }
   0xb   : > { %p50_p2 = scmp.eq.s32.totalorder %s595_s14, 0  ;;  %p55_p3 = scmp.ne.s32.totalorder %s579_s10, %s575_s9 }
   0xc   : > { %s858_s17 = smov (%p35_p0, %s33_s17), 0  ;;  %p56_p5 = scmp.eq.s32.totalorder %s359_s15, 0 }
   0xd   : > { %p656_p4 = por %p50_p2, %p49_p1  ;;  %s37_s20 = ssub.s32 %s591_s13, %s858_s17 }
   0xe   : > { %p109_p6 = scmp.eq.s32.totalorder %s359_s15, 1  ;;  %p40_p7 = scmp.eq.s32.totalorder %s37_s20, 0 }
   0xf   : > { %p662_p8 = por %p56_p5, %p55_p3  ;;  %p115_p10 = scmp.eq.s32.totalorder %s360_s16, 1 }
  0x10   : > { %p666_p9 = por %p109_p6, %p49_p1  ;;  %p398_p13 = scmp.lt.s32.totalorder %s595_s14, 2 }
  0x11   : > { %s840_s21 = scalar_select %p662_p8, 1, 0 }
  0x12   : > { %s841_s22 = scalar_select %p666_p9, 1, 0 }
  0x13   : > { %s671_s23 = scalar_select %p40_p7, %s583_s11, %s42_s18  }
  0x14   : > { %p673_p11 = por %p115_p10, %p55_p3  ;;  %s680_s25 = sand.u32 1, %s583_s11  }
  0x15   : > { %s363_s26 = sshll.u32 %s680_s25, 2  ;;  %s378_s27 = sshll.u32 %s591_s13, 7 }
  0x16   : > { %s842_s24 = scalar_select %p673_p11, 1, 0 }
  0x17   : > { %s689_s30 = scalar_lea.hbm %s834_s0, %s378_s27  ;;  %s139_s3 = scalar_lea.vmem [#allocation2], %s363_s26 }
  0x18   : > { %s149_s4 = sshll.u32 %s139_s3, 4  ;;  %p697_p0 = pnand %p398_p13, %p656_p4  ;;  %s693_s4 = int_to_ptr.vmem [resolvable:$true] %s149_s4 }
  0x19   : > { %s136_s6 = scalar_lea.sflag [#allocation3], %s680_s25  ;;  %s448_s7 = scalar_lea.hbm %s689_s30, 64 }
  0x1a   : > { %p449_p3 = scmp.ne.s32.totalorder %s689_s30, %s448_s7  ;;  %p450_p5 = pneg %p697_p0 }
  0x1b   : > { %s453_s16 = scalar_lea.hbm %s834_s0, 256  ;;  %p454_p4 = scmp.lt.u32.totalorder %s689_s30, %s834_s0 }
  0x1c   : > { %p451_p6 = pnand %p450_p5, %p449_p3  ;;  %p455_p10 = scmp.lt.u32.totalorder %s453_s16, %s448_s7 }
  0x1d   : > { %p457_p12 = scmp.lt.u32.totalorder %s448_s7, %s689_s30 }
  0x1e   : > { %p452_p7 = pneg %p451_p6  ;;  %p456_p13 = por %p455_p10, %p454_p4 }
  0x20   : > { %p458_p1 = por %p457_p12, %p456_p13 }
  0x22   : > { %p459_p2 = pnand %p458_p1, %p452_p7 }
  0x24   : > { %462 = shalt.err (!%p459_p2)
}
  0x25   : > { %s463_s20 = scalar_lea.vmem %s693_s4, 64  ;;  %s597_s28 = smov [#allocation2]  }
  0x26   : > { %p464_p3 = scmp.ne.s32.totalorder %s693_s4, %s463_s20  ;;  %s468_s29 = sshll.u32 %s597_s28, 4  ;;  %s469_s29 = int_to_ptr.vmem [resolvable:$false] %s468_s29 }
  0x27   : > { %s470_s3 = scalar_lea.vmem %s469_s29, 128  ;;  %p471_p9 = scmp.lt.s32.totalorder %s693_s4, %s469_s29 }
  0x28   : > { %p466_p6 = pnand %p464_p3, %p450_p5  ;;  %p472_p4 = scmp.lt.s32.totalorder %s470_s3, %s463_s20 }
  0x2a   : > { %p467_p11 = pneg %p466_p6  ;;  %p473_p10 = por %p472_p4, %p471_p9 }
  0x2c   : > { %p474_p12 = pnand %p473_p10, %p467_p11 }
  0x2e   : > { %477 = shalt.err (!%p474_p12)
}
  0x2f   : > { %390 = dma.hbm_to_vmem [thread:$0]  (!%p697_p0), %s689_s30, 64, %s693_s4, %s136_s6  }
  0x30   : > { %p844_p1 = scmp.lt.s32.totalorder %s595_s14, 3  ;;  %p845_p2 = scmp.ge.s32.totalorder %s595_s14, 1 }
  0x31   : > { %s290_s16 = scalar_lea.hbm %s835_s1, %s378_s27  ;;  %s160_s18 = scalar_lea.vmem [#allocation5], %s363_s26 }
  0x32   : > { %p733_p7 = pnand %p845_p2, %p844_p1  ;;  %s171_s19 = sshll.u32 %s160_s18, 4  ;;  %s172_s19 = int_to_ptr.vmem [resolvable:$true] %s171_s19 }
  0x33   : > { %s744_s20 = scalar_lea.hbm %s290_s16, 64  ;;  %s157_s30 = scalar_lea.sflag [#allocation6], %s680_s25 }
  0x34   : > { %s846_s7 = scalar_select %p733_p7, 1, 0 }
  0x35   : > { %s508_s4 = scalar_lea.hbm %s290_s16, 128  ;;  %s483_s27 = scalar_lea.hbm %s835_s1, 256 }
  0x36   : > { %p479_p9 = scmp.ne.s32.totalorder %s744_s20, %s508_s4  ;;  %p484_p3 = scmp.lt.u32.totalorder %s744_s20, %s835_s1 }
  0x37   : > { %p485_p6 = scmp.lt.u32.totalorder %s483_s27, %s508_s4  ;;  %p487_p10 = scmp.lt.u32.totalorder %s508_s4, %s744_s20 }
  0x38   : > { %p481_p11 = pnand %p479_p9, %p450_p5 }
  0x39   : > { %p486_p4 = por %p485_p6, %p484_p3 }
  0x3a   : > { %p482_p13 = pneg %p481_p11 }
  0x3b   : > { %p488_p12 = por %p487_p10, %p486_p4 }
  0x3d   : > { %p489_p1 = pnand %p488_p12, %p482_p13 }
  0x3f   : > { %492 = shalt.err (!%p489_p1)
}
  0x40   : > { %s493_s25 = scalar_lea.vmem %s172_s19, 64  ;;  %s598_s3 = smov [#allocation5]  }
  0x41   : > { %p494_p2 = scmp.ne.s32.totalorder %s172_s19, %s493_s25  ;;  %s498_s8 = sshll.u32 %s598_s3, 4  ;;  %s499_s8 = int_to_ptr.vmem [resolvable:$false] %s498_s8 }
  0x42   : > { %s500_s15 = scalar_lea.vmem %s499_s8, 128  ;;  %p501_p8 = scmp.lt.s32.totalorder %s172_s19, %s499_s8 }
  0x43   : > { %p496_p9 = pnand %p494_p2, %p450_p5  ;;  %p502_p7 = scmp.lt.s32.totalorder %s500_s15, %s493_s25 }
  0x45   : > { %p497_p11 = pneg %p496_p9  ;;  %p503_p3 = por %p502_p7, %p501_p8 }
  0x47   : > { %p504_p6 = pnand %p503_p3, %p497_p11 }
  0x49   : > { %507 = shalt.err (!%p504_p6)
}
  0x4a   : > { %393 = dma.hbm_to_vmem [thread:$0]  (!%p697_p0), %s744_s20, 64, %s172_s19, %s157_s30  }
  0x4b   : > { %p847_p13 = scmp.ne.s32.totalorder %s846_s7, 0 }
  0x4c   : > { %s768_s16 = sand.u32 (!%p847_p13), 1, %s579_s10   ;;  %p848_p5 = scmp.ne.s32.totalorder (!%p847_p13), %s840_s21, 0 }
  0x4d   : > { %180 = sbr.rel (%p847_p13) target bundleno = 113 (0x71), region = 28  ;;  %s370_s18 = sshll.u32 (!%p847_p13), %s768_s16, 2 }
  0x4e   : > { %s183_s4 = scalar_lea.sflag (!%p847_p13), [#allocation3], %s768_s16  ;;  %s186_s6 = scalar_lea.vmem (!%p847_p13), [#allocation2], %s370_s18 }
  0x54   : > { %562 = dma.done.wait (%p848_p5), %s183_s4, 64  }
  0x55   : > { %564 = vsyncadd (%p848_p5), %s183_s4, 4294967232  ;;  %s192_s5 = scalar_lea.sflag [#allocation6], %s768_s16  ;;  %s195_s19 = scalar_lea.vmem [#allocation5], %s370_s18 }
  0x56   : > { %566 = dma.done.wait (%p848_p5), %s192_s5, 64  }
  0x57   : > { %568 = vsyncadd (%p848_p5), %s192_s5, 4294967232  ;;  %v226_v0 = vlaneseq  ;;  %v221_v1 = vld [vmem:[%s186_s6] sm:$0xf]  ;;  %v223_v2 = vld [vmem:[%s195_s19] sm:$0xf]  ;;  %s220_s7 = scalar_lea.vmem [#allocation7], %s370_s18 }
  0x58   : > { %s248_s20 = sshll.u32 %s220_s7, 4  ;;  %s380_s30 = sshll.u32 %s587_s12, 6  ;;  %v222_v3 = vmax.f32 %v221_v1, 0.0  ;;  %v224_v4 = vmax.f32 %v223_v2, 0.0  ;;  %s782_s20 = int_to_ptr.vmem [resolvable:$true] %s248_s20 }
  0x59   : > { %vm228_vm0 = vcmp.lt.s32.totalorder %v226_v0, 512  ;;  %s787_s21 = scalar_lea.hbm %s836_s2, %s380_s30  ;;  %s232_s29 = scalar_lea.sflag [#allocation4], %s768_s16 }
  0x5a   : > { %v225_v5 = vsub.f32 %v222_v3, %v224_v4  ;;  %s509_s26 = scalar_lea.vmem %s782_s20, 64  ;;  %p849_p0 = scmp.ne.s32.totalorder %s841_s22, 0 }
  0x5b   : > { %p510_p8 = scmp.ne.s32.totalorder %s782_s20, %s509_s26  ;;  %s599_s12 = smov [#allocation7]  }
  0x5c   : > { %230 = vst.msk [vmem:[%s220_s7] sm:$0xf] %vm228_vm0, %v225_v5  ;;  %s513_s25 = sshll.u32 %s599_s12, 4  ;;  %s514_s25 = int_to_ptr.vmem [resolvable:$false] %s513_s25 }
  0x5d   : > { %p511_p7 = pnand %p510_p8, %p849_p0  ;;  %s515_s3 = scalar_lea.vmem %s514_s25, 128 }
  0x5e   : > { %p516_p10 = scmp.lt.s32.totalorder %s782_s20, %s514_s25  ;;  %p517_p12 = scmp.lt.s32.totalorder %s515_s3, %s509_s26 }
  0x5f   : > { %p512_p4 = pneg %p511_p7 }
  0x60   : > { %p518_p1 = por %p517_p12, %p516_p10 }
  0x62   : > { %p519_p2 = pnand %p518_p1, %p512_p4 }
  0x64   : > { %522 = shalt.err (!%p519_p2)
}
  0x65   : > { %s523_s8 = scalar_lea.hbm %s787_s21, 64  ;;  %s527_s18 = scalar_lea.hbm %s836_s2, 128 }
  0x66   : > { %p524_p9 = scmp.ne.s32.totalorder %s787_s21, %s523_s8  ;;  %p528_p6 = scmp.lt.u32.totalorder %s787_s21, %s836_s2 }
  0x67   : > { %p529_p13 = scmp.lt.u32.totalorder %s527_s18, %s523_s8  ;;  %p531_p8 = scmp.lt.u32.totalorder %s523_s8, %s787_s21 }
  0x68   : > { %p525_p11 = pnand %p524_p9, %p849_p0 }
  0x69   : > { %p530_p5 = por %p529_p13, %p528_p6 }
  0x6a   : > { %p526_p3 = pneg %p525_p11 }
  0x6b   : > { %p532_p7 = por %p531_p8, %p530_p5 }
  0x6d   : > { %p533_p4 = pnand %p532_p7, %p526_p3 }
  0x6f   : > { %536 = shalt.err (!%p533_p4)
}
  0x70   : > { %385 = dma.vmem_to_hbm [thread:$0]  (%p849_p0), %s782_s20, 64, %s787_s21, %s232_s29  }
  0x71 PF: > { %s260_s5 = sand.u32 1, %s575_s9   ;;  %p850_p10 = scmp.ne.s32.totalorder %s842_s24, 0 }
  0x72   : > { %p851_p12 = scmp.ge.s32.totalorder %s595_s14, 2  ;;  %s261_s19 = scalar_lea.sflag [#allocation4], %s260_s5 }
  0x74   : > { %p395_p1 = pnand %p851_p12, %p850_p10 }
  0x76   : > { %570 = dma.done.wait (!%p395_p1), %s261_s19, 64  }
  0x77   : > { %572 = vsyncadd (!%p395_p1), %s261_s19, 4294967232  ;;  %s21_s14 = sadd.s32 1, %s595_s14   ;;  %s852_s9 = smov %s579_s10 }
  0x78   : > { %p18_p2 = scmp.ge.s32.totalorder %s21_s14, 4   ;;  %s853_s10 = smov %s583_s11 }
  0x79   : > { %s854_s11 = smov %s671_s23  ;;  %s855_s12 = smov %s591_s13 }
  0x7a   : > { %s856_s13 = smov %s858_s17  ;;  %20 = sbr.rel (!%p18_p2) target bundleno = 8 (0x8), region = 86 }
  0x81   :  { %266 = vsyncpa [#allocation3], 1 }
  0x82   :  { %268 = vsyncpa [#allocation3 + $0x1], 1 }
  0x83   :  { %269 = vsyncpa [#allocation6], 1 }
  0x84   :  { %271 = vsyncpa [#allocation6 + $0x1], 1 }
  0x85   :  { %272 = vsyncpa [#allocation4], 1 }
  0x86   :  { %274 = vsyncpa [#allocation4 + $0x1], 1 }

</bundles_post_ra>
